<compile_context>
chip_gen: v6e
topology: v6e:2x2x1
jax: 0.10.0
libtpu: 0.0.40
codegen_flags: <defaults>
</compile_context>

<pallas_src>
import functools

import jax
import jax.numpy as jnp
from jax import lax
from jax.experimental import pallas as pl
from jax.experimental.pallas import tpu as pltpu


# ----------------------------------------------------------------------------
# Fused Pallas kernel: two nn.Linear projections, one launch, one output slab.
#   mol_out = xm @ wm.T + bm    (contract K in-kernel; wm stays (N, K))
#   txt_out = xt @ wt.T + bt
#   o[:, :N]  = mol_out ; o[:, N:] = txt_out
# ----------------------------------------------------------------------------
def _clip_proj_kernel(xm_ref, wm_ref, bm_ref, xt_ref, wt_ref, bt_ref, o_ref,
                      *, precision):
    dn = (((1,), (1,)), ((), ()))  # contract dim 1 of x with dim 1 of w (= x @ w.T)
    mol = lax.dot_general(
        xm_ref[...], wm_ref[...], dn,
        precision=precision, preferred_element_type=jnp.float32,
    ) + bm_ref[...]
    txt = lax.dot_general(
        xt_ref[...], wt_ref[...], dn,
        precision=precision, preferred_element_type=jnp.float32,
    ) + bt_ref[...]
    n = mol.shape[-1]
    o_ref[:, :n] = mol.astype(o_ref.dtype)
    o_ref[:, n:] = txt.astype(o_ref.dtype)


def clip_project(mol_repr, pooler_output, mol_w, mol_b, txt_w, txt_b,
                 *, use_bf16=False):
    """Fused PyTorch nn.Linear pair with a shared launch.

    mol_repr:      (B, Kg) f32     pooler_output: (B, Kt) f32
    mol_w:         (N, Kg) f32     txt_w:         (N, Kt) f32   (PyTorch layout)
    mol_b, txt_b:  (N,)    f32
    returns (mol_latent, txt_latent), each (B, N) f32.
    """
    B, Kg = mol_repr.shape
    B2, Kt = pooler_output.shape
    assert B == B2, (B, B2)
    N, Kg2 = mol_w.shape
    N2, Kt2 = txt_w.shape
    assert Kg == Kg2 and Kt == Kt2 and N == N2, (mol_w.shape, txt_w.shape)

    xm, wm = mol_repr, mol_w
    xt, wt = pooler_output, txt_w
    if use_bf16:
        # v5e/v6e fast path: bf16 MXU inputs, f32 accumulation (production
        # inference default; loosens the strict f32 check).
        xm, wm = xm.astype(jnp.bfloat16), wm.astype(jnp.bfloat16)
        xt, wt = xt.astype(jnp.bfloat16), wt.astype(jnp.bfloat16)
        precision = lax.Precision.DEFAULT
    else:
        precision = lax.Precision.HIGHEST

    bm2 = mol_b.reshape(1, N).astype(jnp.float32)
    bt2 = txt_b.reshape(1, N).astype(jnp.float32)

    operands = (xm, wm, bm2, xt, wt, bt2)
    flops = 2 * B * Kg * N + 2 * B * Kt * N
    out_bytes = B * 2 * N * 4
    bytes_accessed = sum(int(a.size) * a.dtype.itemsize for a in operands) + out_bytes

    vmem = pltpu.MemorySpace.VMEM
    out = pl.pallas_call(
        functools.partial(_clip_proj_kernel, precision=precision),
        out_shape=jax.ShapeDtypeStruct((B, 2 * N), jnp.float32),
        in_specs=[pl.BlockSpec(memory_space=vmem)] * len(operands),
        out_specs=pl.BlockSpec(memory_space=vmem),
        cost_estimate=pl.CostEstimate(
            flops=flops, transcendentals=0, bytes_accessed=bytes_accessed
        ),
    )(*operands)

    return out[:, :N], out[:, N:]


# ----------------------------------------------------------------------------
# CLIP module (forward only), parameters built deterministically in-script.
# ----------------------------------------------------------------------------
class CLIPPallas:
    def __init__(self, key, *, gnn_emb_dim=32, ssl_emb_dim=32, text_dim=768):
        self.molecule_dim = gnn_emb_dim
        self.text_dim = text_dim          # fixed to 768 in the reference module
        self.ssl_emb_dim = ssl_emb_dim

        k1, k2, k3, k4 = jax.random.split(key, 4)
        # nn.Linear(text_dim, SSL_emb_dim)   — PyTorch layout (out, in)
        self.text2latent_w = (
            jax.random.normal(k1, (ssl_emb_dim, text_dim), jnp.float32) * 0.02
        )
        self.text2latent_b = (
            jax.random.normal(k2, (ssl_emb_dim,), jnp.float32) * 0.02
        )
        # nn.Linear(molecule_dim, SSL_emb_dim)
        self.mol2latent_w = (
            jax.random.normal(k3, (ssl_emb_dim, gnn_emb_dim), jnp.float32) * 0.02
        )
        self.mol2latent_b = (
            jax.random.normal(k4, (ssl_emb_dim,), jnp.float32) * 0.02
        )

    def forward(self, molecule_repr, pooler_output, *, use_bf16=False):
        # molecule_repr stands in for self.gnn(molecule_data)[0]   (B, gnn_emb_dim)
        # pooler_output stands in for self.text_model(...)["pooler_output"]  (B, 768)
        s_image_features, text_features = clip_project(
            molecule_repr, pooler_output,
            self.mol2latent_w, self.mol2latent_b,
            self.text2latent_w, self.text2latent_b,
            use_bf16=use_bf16,
        )
        return s_image_features, text_features


if __name__ == "__main__":
    key = jax.random.PRNGKey(0)
    k_model, k_mol, k_txt = jax.random.split(key, 3)

    B = 8                      # batch of graph/text pairs
    GNN_EMB_DIM = 32           # args.gnn_emb_dim
    SSL_EMB_DIM = 32           # args.SSL_emb_dim
    TEXT_DIM = 768             # fixed in the reference module

    model = CLIPPallas(
        k_model, gnn_emb_dim=GNN_EMB_DIM, ssl_emb_dim=SSL_EMB_DIM, text_dim=TEXT_DIM
    )

    # Deterministic stand-ins for the pretrained encoder outputs.
    molecule_repr = jax.random.normal(k_mol, (B, GNN_EMB_DIM), jnp.float32)
    pooler_output = jax.random.normal(k_txt, (B, TEXT_DIM), jnp.float32)

    s_image_features, text_features = model.forward(molecule_repr, pooler_output)
    jax.block_until_ready((s_image_features, text_features))

    # Cross-check against a plain-JAX f32 reference of the nn.Linear semantics.
    ref_img = (
        jnp.dot(molecule_repr, model.mol2latent_w.T,
                preferred_element_type=jnp.float32,
                precision=lax.Precision.HIGHEST)
        + model.mol2latent_b
    )
    ref_txt = (
        jnp.dot(pooler_output, model.text2latent_w.T,
                preferred_element_type=jnp.float32,
                precision=lax.Precision.HIGHEST)
        + model.text2latent_b
    )
    assert s_image_features.shape == (B, SSL_EMB_DIM)
    assert text_features.shape == (B, SSL_EMB_DIM)
    assert jnp.allclose(s_image_features, ref_img, atol=1e-5, rtol=1e-5)
    assert jnp.allclose(text_features, ref_txt, atol=1e-5, rtol=1e-5)

    print("KERNEL_OK")
</pallas_src>

<mosaic_0001>
module attributes {stable_mosaic.version = 11 : i64} {
  func.func @_clip_proj_kernel(%arg0: memref<8x32xf32, #tpu.memory_space<vmem>>, %arg1: memref<32x32xf32, #tpu.memory_space<vmem>>, %arg2: memref<1x32xf32, #tpu.memory_space<vmem>>, %arg3: memref<8x768xf32, #tpu.memory_space<vmem>>, %arg4: memref<32x768xf32, #tpu.memory_space<vmem>>, %arg5: memref<1x32xf32, #tpu.memory_space<vmem>>, %arg6: memref<8x64xf32, #tpu.memory_space<vmem>>) attributes {dimension_semantics = [], scalar_prefetch = 0 : i64, scratch_operands = 0 : i64, tpu.core_type = #tpu.core_type<tc>} {
    %c0 = arith.constant 0 : index
    %c0_0 = arith.constant 0 : index
    %0 = vector.load %arg0[%c0, %c0_0] : memref<8x32xf32, #tpu.memory_space<vmem>>, vector<8x32xf32>
    %c0_1 = arith.constant 0 : index
    %c0_2 = arith.constant 0 : index
    %1 = vector.load %arg1[%c0_1, %c0_2] : memref<32x32xf32, #tpu.memory_space<vmem>>, vector<32x32xf32>
    %cst = arith.constant dense<0.000000e+00> : vector<8x32xf32>
    %2 = tpu.matmul %0, %1, %cst {dimension_numbers = #tpu.dot_dimension_numbers<[1], [1], [0], [0], [0, 0, 1, 0], [], []>, precision = #tpu.contract_precision<fp32>} : vector<8x32xf32>, vector<32x32xf32>, vector<8x32xf32> -> vector<8x32xf32>
    %c0_3 = arith.constant 0 : index
    %c0_4 = arith.constant 0 : index
    %3 = vector.load %arg2[%c0_3, %c0_4] : memref<1x32xf32, #tpu.memory_space<vmem>>, vector<1x32xf32>
    %4 = vector.broadcast %3 : vector<1x32xf32> to vector<8x32xf32>
    %5 = arith.addf %2, %4 : vector<8x32xf32>
    %c0_5 = arith.constant 0 : index
    %c0_6 = arith.constant 0 : index
    %6 = vector.load %arg3[%c0_5, %c0_6] : memref<8x768xf32, #tpu.memory_space<vmem>>, vector<8x768xf32>
    %c0_7 = arith.constant 0 : index
    %c0_8 = arith.constant 0 : index
    %7 = vector.load %arg4[%c0_7, %c0_8] : memref<32x768xf32, #tpu.memory_space<vmem>>, vector<32x768xf32>
    %cst_9 = arith.constant dense<0.000000e+00> : vector<8x32xf32>
    %8 = tpu.matmul %6, %7, %cst_9 {dimension_numbers = #tpu.dot_dimension_numbers<[1], [1], [0], [0], [0, 0, 1, 0], [], []>, precision = #tpu.contract_precision<fp32>} : vector<8x768xf32>, vector<32x768xf32>, vector<8x32xf32> -> vector<8x32xf32>
    %c0_10 = arith.constant 0 : index
    %c0_11 = arith.constant 0 : index
    %9 = vector.load %arg5[%c0_10, %c0_11] : memref<1x32xf32, #tpu.memory_space<vmem>>, vector<1x32xf32>
    %10 = vector.broadcast %9 : vector<1x32xf32> to vector<8x32xf32>
    %11 = arith.addf %8, %10 : vector<8x32xf32>
    %c0_12 = arith.constant 0 : index
    %c0_13 = arith.constant 0 : index
    %12 = vector.load %arg6[%c0_12, %c0_13] : memref<8x64xf32, #tpu.memory_space<vmem>>, vector<8x32xf32>
    tpu.vector_store %arg6[%c0_12, %c0_13], %5 {strides = array<i32>} : memref<8x64xf32, #tpu.memory_space<vmem>>, vector<8x32xf32>,
    %c0_14 = arith.constant 0 : index
    %c32 = arith.constant 32 : index
    %13 = vector.load %arg6[%c0_14, %c32] : memref<8x64xf32, #tpu.memory_space<vmem>>, vector<8x32xf32>
    tpu.vector_store %arg6[%c0_14, %c32], %11 {strides = array<i32>} : memref<8x64xf32, #tpu.memory_space<vmem>>, vector<8x32xf32>,
    return
  }
}

</mosaic_0001>

<bundles_post_ra>
// kernel: tpu_custom_call.1
= control target key start
LH: loop header
LB: loop body
LE: loop exit
PB: predicated region body
PF: predicated region fallthrough
CT: control target
= control target key end

     0   :  { %11 = vsyncpa [#allocation3], 0  ;;  %s3115_s0 = inlined_call_operand.hbm [shape: f32[8,32], index: 0, kind: input, shape index: {}]   ;;  %s3116_s1 = inlined_call_operand.hbm [shape: f32[32,32], index: 1, kind: input, shape index: {}]   ;;  %s3117_s2 = inlined_call_operand.vmem [shape: f32[1,32], index: 2, kind: input, shape index: {}]   ;;  %s3118_s3 = inlined_call_operand.hbm [shape: f32[8,768], index: 3, kind: input, shape index: {}]   ;;  %s3119_s4 = inlined_call_operand.hbm [shape: f32[32,768], index: 4, kind: input, shape index: {}]   ;;  %s3120_s5 = inlined_call_operand.vmem [shape: f32[1,32], index: 5, kind: input, shape index: {}]   ;;  %s3121_s6 = inlined_call_operand.hbm [shape: f32[8,64], index: 6, kind: output, shape index: {}]  }
   0x1   :  { %12 = vsyncpa [#allocation6], 0 }
   0x2   :  { %13 = vsyncpa [#allocation9], 0 }
   0x3   :  { %14 = vsyncpa [#allocation4], 0  ;;  %s2517_s21 = smov [#allocation5]  }
   0x4   :  { %s30_s22 = sshll.u32 %s2517_s21, 4  ;;  %s31_s22 = int_to_ptr.vmem [resolvable:$true] %s30_s22 }
   0x5   :  { %s2417_s23 = scalar_lea.vmem %s31_s22, 512  ;;  %p2422_p1 = scmp.lt.s32.totalorder %s31_s22, %s31_s22 }
   0x6   :  { %p2418_p0 = scmp.ne.s32.totalorder %s31_s22, %s2417_s23  ;;  %p2423_p2 = scmp.lt.s32.totalorder %s2417_s23, %s2417_s23 }
   0x8   :  { %p2424_p3 = por %p2423_p2, %p2422_p1 }
   0xa   :  { %p2425_p4 = pnand %p2424_p3, %p2418_p0 }
   0xc   :  { %2428 = shalt.err (!%p2425_p4)
}
   0xd   :  { %s2518_s24 = smov 128   ;;  %s2519_s25 = smov 8  }
   0xe   :  { %36 = dma.hbm_to_vmem [thread:$0]  %s3116_s1, 512, %s31_s22, [#allocation6], %s2518_s24, %s2518_s24, %s2519_s25  }
   0xf   :  { %s2520_s28 = smov [#allocation2]   ;;  %s2521_s30 = smov [#allocation7]  }
  0x10   :  { %s21_s29 = sshll.u32 %s2520_s28, 4  ;;  %s45_s7 = sshll.u32 %s2521_s30, 4  ;;  %s22_s29 = int_to_ptr.vmem [resolvable:$true] %s21_s29  ;;  %s46_s7 = int_to_ptr.vmem [resolvable:$true] %s45_s7 }
  0x11   :  { %s2437_s8 = scalar_lea.vmem %s22_s29, 128  ;;  %p2442_p6 = scmp.lt.s32.totalorder %s22_s29, %s22_s29 }
  0x12   :  { %p2438_p5 = scmp.ne.s32.totalorder %s22_s29, %s2437_s8  ;;  %p2443_p7 = scmp.lt.s32.totalorder %s2437_s8, %s2437_s8 }
  0x14   :  { %p2444_p8 = por %p2443_p7, %p2442_p6 }
  0x16   :  { %p2445_p9 = pnand %p2444_p8, %p2438_p5 }
  0x18   :  { %2448 = shalt.err (!%p2445_p9)
}
  0x19   :  { %24 = dma.hbm_to_vmem [thread:$0]  %s3115_s0, 128, %s22_s29, [#allocation3]  }
  0x1a   :  { %s2457_s11 = scalar_lea.vmem %s46_s7, 768  ;;  %p2462_p11 = scmp.lt.s32.totalorder %s46_s7, %s46_s7 }
  0x1b   :  { %p2458_p10 = scmp.ne.s32.totalorder %s46_s7, %s2457_s11  ;;  %p2463_p12 = scmp.lt.s32.totalorder %s2457_s11, %s2457_s11 }
  0x1d   :  { %p2464_p13 = por %p2463_p12, %p2462_p11 }
  0x1f   :  { %p2465_p0 = pnand %p2464_p13, %p2458_p10 }
  0x21   :  { %2468 = shalt.err (!%p2465_p0)
}
  0x22   :  { %48 = dma.hbm_to_vmem [thread:$0]  %s3118_s3, 768, %s46_s7, [#allocation6]  }
  0x23   :  { %s2522_s13 = smov [#allocation8]  }
  0x24   :  { %s54_s14 = sshll.u32 %s2522_s13, 4  ;;  %s55_s14 = int_to_ptr.vmem [resolvable:$true] %s54_s14 }
  0x25   :  { %s2477_s15 = scalar_lea.vmem %s55_s14, 3072  ;;  %p2482_p2 = scmp.lt.s32.totalorder %s55_s14, %s55_s14 }
  0x26   :  { %p2478_p1 = scmp.ne.s32.totalorder %s55_s14, %s2477_s15  ;;  %p2483_p3 = scmp.lt.s32.totalorder %s2477_s15, %s2477_s15 }
  0x28   :  { %p2484_p4 = por %p2483_p3, %p2482_p2 }
  0x2a   :  { %p2485_p5 = pnand %p2484_p4, %p2478_p1 }
  0x2c   :  { %2488 = shalt.err (!%p2485_p5)
}
  0x2d   :  { %s2523_s0 = smov 768   ;;  %s2524_s16 = smov 48  }
  0x2e   :  { %60 = dma.hbm_to_vmem [thread:$0]  %s3119_s4, 3072, %s55_s14, [#allocation9], %s2523_s0, %s2523_s0, %s2524_s16  }
  0x2f   :  { %2509 = dma.done.wait [#allocation3], 128  }
  0x30   :  { %2510 = vsyncadd [#allocation3], 4294967168 }
  0x31   :  { %2511 = dma.done.wait [#allocation6], 1280  }
  0x32   :  { %2512 = vsyncadd [#allocation6], 4294966016 }
  0x33   :  { %2513 = dma.done.wait [#allocation9], 3072  }
  0x34   :  { %2514 = vsyncadd [#allocation9], 4294964224  ;;  %v2525_v0 = vmov 0.0   ;;  %vm2526_vm0 = vmmov 0   ;;  %vm87_vm1 = vcmask 261120   ;;  %v79_v1 = vld [vmem:[#allocation5 + $0x18] sm:$0xff] }
  0x35   :  { %2331 = vmatprep.subr.mxu0 %v2525_v0  ;;  %2342 = vmatprep.subr.mxu1 %v2525_v0  ;;  %v78_v2 = vld [vmem:[#allocation5 + $0x10] sm:$0xff]  ;;  %v77_v3 = vld [vmem:[#allocation5 + $0x8] sm:$0xff]  ;;  %v101_v4 = vsel %vm87_vm1, %v79_v1, 0  ;;  %v76_v7 = vld [vmem:[#allocation5] sm:$0xff]  ;;  %vm2280_vm2 = vcmask 523520  }
  0x36   :  { %2339 = vmatprep.mubr.msk.f32.mxu0 %vm2526_vm0, %v2525_v0  ;;  %2350 = vmatprep.mubr.msk.f32.mxu1 %vm2526_vm0, %v2525_v0  ;;  %v98_v5 = vsel %vm87_vm1, %v78_v2, 0  ;;  %v95_v6 = vsel %vm87_vm1, %v77_v3, 0  ;;  %v75_v8 = vld [vmem:[#allocation2] sm:$0xff]  ;;  %v2585_v9 = vand.u32 4294901760, %v101_v4  ;;  %v92_v12 = vsel %vm87_vm1, %v76_v7, 0  ;;  %v589_v36 = vld [vmem:[#allocation7 + $0x8] sm:$0xff] }
  0x37   :  { %v2587_v10 = vand.u32 4294901760, %v98_v5  ;;  %v2589_v11 = vand.u32 4294901760, %v95_v6  ;;  %v2592_v13 = vand.u32 4294901760, %v92_v12  ;;  %v89_v14 = vsel %vm87_vm1, %v75_v8, 0  ;;  %v613_v37 = vld [vmem:[#allocation8 + $0x98] sm:$0xff]  ;;  %v612_v40 = vld [vmem:[#allocation8 + $0x90] sm:$0xff] }
  0x38   :  { %2332 = vmatpush3.xpose.msra.mxu0 %v2585_v9  ;;  %v208_v15 = vsub.f32 %v101_v4, %v2585_v9  ;;  %v2600_v17 = vand.u32 4294901760, %v89_v14  ;;  %v2648_v38 = vand.u32 4294901760, %v589_v36  ;;  %v2654_v39 = vand.u32 4294901760, %v613_v37  ;;  %v607_v41 = vld [vmem:[#allocation8 + $0x68] sm:$0xff]  ;;  %v606_v45 = vld [vmem:[#allocation8 + $0x60] sm:$0xff]  ;;  %v601_v47 = vld [vmem:[#allocation8 + $0x38] sm:$0xff] }
  0x39   :  { %v2598_v16 = vsub.f32 %v98_v5, %v2587_v10  ;;  %v2603_v18 = vsub.f32 %v95_v6, %v2589_v11  ;;  %2333 = vmatprep.subr.mxu0 %v2525_v0  ;;  %v2611_v22 = vsub.f32 %v92_v12, %v2592_v13  ;;  %v2662_v43 = vand.u32 4294901760, %v612_v40  ;;  %v588_v51 = vld [vmem:[#allocation7] sm:$0xff]  ;;  %v595_v56 = vld [vmem:[#allocation8 + $0x8] sm:$0xff]  ;;  %v594_v2 = vld [vmem:[#allocation8] sm:$0xff] }
  0x3a   :  { %v209_v19 = vand.u32 4294901760, %v208_v15  ;;  %v2608_v21 = vsub.f32 %v89_v14, %v2600_v17  ;;  %v2659_v42 = vsub.f32 %v589_v36, %v2648_v38  ;;  %v2666_v44 = vand.u32 4294901760, %v607_v41  ;;  %v600_v54 = vld [vmem:[#allocation8 + $0x30] sm:$0xff]  ;;  %v614_v36 = vld [vmem:[#allocation8 + $0xa0] sm:$0xff] }
  0x3b   :  { %v216_v20 = vand.u32 4294901760, %v2598_v16  ;;  %v223_v26 = vand.u32 4294901760, %v2603_v18  ;;  %v230_v31 = vand.u32 4294901760, %v2611_v22  ;;  %v2669_v46 = vsub.f32 %v613_v37, %v2654_v39  ;;  %v609_v37 = vld [vmem:[#allocation8 + $0x78] sm:$0xff] }
  0x3c   :  { %2334 = vmatpush3.xpose.msra.mxu0 %v2587_v10  ;;  %v210_v23 = vsub.f32 %v208_v15, %v209_v19  ;;  %v174_v25 = vand.u32 4294901760, %v2608_v21  ;;  %v699_v48 = vand.u32 4294901760, %v2659_v42  ;;  %v2674_v49 = vsub.f32 %v612_v40, %v2662_v43 }
  0x3d   :  { %v217_v24 = vsub.f32 %v2598_v16, %v216_v20  ;;  %2335 = vmatprep.subr.mxu0 %v2525_v0  ;;  %v224_v30 = vsub.f32 %v2603_v18, %v223_v26  ;;  %v231_v34 = vsub.f32 %v2611_v22, %v230_v31  ;;  %v2676_v50 = vand.u32 4294901760, %v606_v45 }
  0x3e   :  { %v211_v27 = vand.u32 4294901760, %v210_v23  ;;  %v175_v28 = vsub.f32 %v2608_v21, %v174_v25  ;;  %v2680_v52 = vand.u32 4294901760, %v601_v47  ;;  %v739_v53 = vand.u32 4294901760, %v2669_v46 }
  0x3f   :  { %v218_v29 = vand.u32 4294901760, %v217_v24  ;;  %v225_v33 = vand.u32 4294901760, %v224_v30  ;;  %v232_v35 = vand.u32 4294901760, %v231_v34  ;;  %v2684_v55 = vsub.f32 %v607_v41, %v2666_v44 }
  0x40   :  { %2336 = vmatpush3.xpose.msra.mxu0 %v2589_v11  ;;  %2343 = vmatpush3.xpose.msra.mxu1 %v211_v27  ;;  %v176_v32 = vand.u32 4294901760, %v175_v28  ;;  %v700_v57 = vsub.f32 %v2659_v42, %v699_v48  ;;  %v2691_v58 = vand.u32 4294901760, %v588_v51  ;;  %v2697_v59 = vsub.f32 %v606_v45, %v2676_v50  ;;  %v608_v45 = vld [vmem:[#allocation8 + $0x70] sm:$0xff] }
  0x41   :  { %2337 = vmatprep.subr.mxu0 %v2525_v0  ;;  %2344 = vmatprep.subr.mxu1 %v2525_v0  ;;  %v2699_v60 = vand.u32 4294901760, %v600_v54  ;;  %v745_v61 = vand.u32 4294901760, %v2674_v49  ;;  %v740_v62 = vsub.f32 %v2669_v46, %v739_v53  ;;  %v2707_v63 = vand.u32 4294901760, %v595_v56 }
  0x42   :  { %v751_v1 = vand.u32 4294901760, %v2684_v55  ;;  %v2711_v3 = vsub.f32 %v601_v47, %v2680_v52  ;;  %v701_v4 = vand.u32 4294901760, %v700_v57  ;;  %v2715_v5 = vsub.f32 %v588_v51, %v2691_v58  ;;  %v603_v47 = vld [vmem:[#allocation8 + $0x48] sm:$0xff]  ;;  %v590_v51 = vld [vmem:[#allocation7 + $0x10] sm:$0xff] }
  0x43   :  { %v2720_v6 = vsub.f32 %v600_v54, %v2699_v60  ;;  %v746_v7 = vsub.f32 %v2674_v49, %v745_v61  ;;  %v2725_v8 = vand.u32 4294901760, %v594_v2  ;;  %v2735_v14 = vsub.f32 %v595_v56, %v2707_v63 }
  0x44   :  { %2338 = vmatpush3.xpose.msra.mxu0 %v2592_v13  ;;  %2345 = vmatpush3.xpose.msra.mxu1 %v218_v29  ;;  %v763_v12 = vand.u32 4294901760, %v2711_v3  ;;  %v2807_v41 = vand.u32 4294901760, %v614_v36 }
  0x45   :  { %2346 = vmatprep.subr.mxu1 %v2525_v0  ;;  %2353 = vmatprep.subr.mxu0 %v2525_v0 }
  0x47   :  { %2340 = vmatmul.mubr.f32.vlgmr.msra.gmra.mxu0 %v176_v32  ;;  %v591_v32 = vld [vmem:[#allocation7 + $0x18] sm:$0xff] }
  0x48   :  { %2347 = vmatpush3.xpose.msra.mxu1 %v225_v33  ;;  %2354 = vmatpush3.xpose.msra.mxu0 %v208_v15  ;;  %v705_v15 = vand.u32 4294901760, %v2715_v5  ;;  %v615_v33 = vld [vmem:[#allocation8 + $0xa8] sm:$0xff]  ;;  %v2789_v34 = vand.u32 4294901760, %v591_v32 }
  0x49   :  { %2348 = vmatprep.subr.mxu1 %v2525_v0  ;;  %2355 = vmatprep.subr.mxu0 %v2525_v0 }
  0x4a   :  { %2361 = vmatprep.mubr.msk.f32.mxu0 %vm2526_vm0, %v2525_v0  ;;  %v2802_v40 = vsub.f32 %v591_v32, %v2789_v34  ;;  %v616_v32 = vld [vmem:[#allocation8 + $0xb0] sm:$0xff] }
  0x4c   :  { %2349 = vmatpush3.xpose.msra.mxu1 %v232_v35  ;;  %2356 = vmatpush3.xpose.msra.mxu0 %v2598_v16  ;;  %v2741_v16 = vsub.f32 %v594_v2, %v2725_v8  ;;  %v2798_v35 = vand.u32 4294901760, %v615_v33 }
  0x4d   :  { %2357 = vmatprep.subr.mxu0 %v2525_v0  ;;  %2364 = vmatprep.subr.mxu1 %v2525_v0 }
  0x4f   :  { %2351 = vmatmul.mubr.f32.vlgmr.msra.gmra.mxu1 %v2600_v17 }
  0x50   :  { %2358 = vmatpush3.xpose.msra.mxu0 %v2603_v18  ;;  %2365 = vmatpush3.xpose.msra.mxu1 %v2585_v9 }
  0x51   :  { %2359 = vmatprep.subr.mxu0 %v2525_v0  ;;  %2366 = vmatprep.subr.mxu1 %v2525_v0 }
  0x52   :  { %2372 = vmatprep.mubr.msk.f32.mxu1 %vm2526_vm0, %v2525_v0 }
  0x54   :  { %2360 = vmatpush3.xpose.msra.mxu0 %v2611_v22  ;;  %2367 = vmatpush3.xpose.msra.mxu1 %v2587_v10  ;;  %v706_v22 = vsub.f32 %v2715_v5, %v705_v15 }
  0x55   :  { %2368 = vmatprep.subr.mxu1 %v2525_v0  ;;  %2375 = vmatprep.subr.mxu0 %v2525_v0 }
  0x56   :  { %v707_v27 = vand.u32 4294901760, %v706_v22 }
  0x57   :  { %2362 = vmatmul.mubr.f32.vlgmr.msra.gmra.mxu0 %v2608_v21  ;;  %v775_v21 = vand.u32 4294901760, %v2735_v14 }
  0x58   :  { %2369 = vmatpush3.xpose.msra.mxu1 %v2589_v11  ;;  %2376 = vmatpush3.xpose.msra.mxu0 %v209_v19  ;;  %v769_v19 = vand.u32 4294901760, %v2720_v6 }
  0x59   :  { %2370 = vmatprep.subr.mxu1 %v2525_v0  ;;  %2377 = vmatprep.subr.mxu0 %v2525_v0 }
  0x5a   :  { %2383 = vmatprep.mubr.msk.f32.mxu0 %vm2526_vm0, %v2525_v0  ;;  %v770_v24 = vsub.f32 %v2720_v6, %v769_v19 }
  0x5c   :  { %2371 = vmatpush3.xpose.msra.mxu1 %v2592_v13  ;;  %2378 = vmatpush3.xpose.msra.mxu0 %v216_v20  ;;  %v771_v28 = vand.u32 4294901760, %v770_v24 }
  0x5d   :  { %2379 = vmatprep.subr.mxu0 %v2525_v0  ;;  %2386 = vmatprep.subr.mxu1 %v2525_v0 }
  0x5f   :  { %2373 = vmatmul.mubr.f32.vlgmr.msra.gmra.mxu1 %v174_v25  ;;  %v781_v25 = vand.u32 4294901760, %v2741_v16 }
  0x60   :  { %2380 = vmatpush3.xpose.msra.mxu0 %v223_v26  ;;  %2387 = vmatpush3.xpose.msra.mxu1 %v2585_v9  ;;  %v757_v9 = vand.u32 4294901760, %v2697_v59 }
  0x61   :  { %2381 = vmatprep.subr.mxu0 %v2525_v0  ;;  %2388 = vmatprep.subr.mxu1 %v2525_v0  ;;  %v782_v29 = vsub.f32 %v2741_v16, %v781_v25 }
  0x62   :  { %2394 = vmatprep.mubr.msk.f32.mxu1 %vm2526_vm0, %v2525_v0  ;;  %v758_v18 = vsub.f32 %v2697_v59, %v757_v9 }
  0x64   :  { %2382 = vmatpush3.xpose.msra.mxu0 %v230_v31  ;;  %2389 = vmatpush3.xpose.msra.mxu1 %v2587_v10  ;;  %v741_v10 = vand.u32 4294901760, %v740_v62  ;;  %v759_v23 = vand.u32 4294901760, %v758_v18  ;;  %v783_v31 = vand.u32 4294901760, %v782_v29  ;;  %v617_v29 = vld [vmem:[#allocation8 + $0xb8] sm:$0xff] }
  0x65   :  { %2390 = vmatprep.subr.mxu1 %v2525_v0  ;;  %650 = vmatprep.subr.mxu0 %v2654_v39 }
  0x67   :  { %2384 = vmatmul.mubr.f32.vlgmr.msra.gmra.mxu0 %v2600_v17 }
  0x68   :  { %2391 = vmatpush3.xpose.msra.mxu1 %v2589_v11  ;;  %652 = vmatpush1.xpose.msra.mxu0 %v2662_v43  ;;  %v752_v11 = vsub.f32 %v2684_v55, %v751_v1 }
  0x69   :  { %2392 = vmatprep.subr.mxu1 %v2525_v0  ;;  %654 = vmatprep.subr.mxu0 %v2666_v44  ;;  %v747_v0 = vand.u32 4294901760, %v746_v7 }
  0x6a   :  { %702 = vmatprep.mubr.f32.mxu0 %v701_v4  ;;  %v753_v20 = vand.u32 4294901760, %v752_v11 }
  0x6c   :  { %2393 = vmatpush3.xpose.msra.mxu1 %v2592_v13  ;;  %656 = vmatpush1.xpose.msra.mxu0 %v2676_v50  ;;  %v764_v13 = vsub.f32 %v2711_v3, %v763_v12 }
  0x6d   :  { %658 = vmatprep.subr.mxu0 %v2680_v52  ;;  %742 = vmatprep.subr.mxu1 %v741_v10 }
  0x6e   :  { %v765_v26 = vand.u32 4294901760, %v764_v13 }
  0x6f   :  { %2395 = vmatmul.mubr.f32.vlgmr.msra.gmra.mxu1 %v2600_v17  ;;  %v776_v17 = vsub.f32 %v2735_v14, %v775_v21 }
  0x70   :  { %660 = vmatpush1.xpose.msra.mxu0 %v2699_v60  ;;  %748 = vmatpush1.xpose.msra.mxu1 %v747_v0 }
  0x71   :  { %662 = vmatprep.subr.mxu0 %v2707_v63  ;;  %754 = vmatprep.subr.mxu1 %v753_v20  ;;  %v777_v30 = vand.u32 4294901760, %v776_v17 }
  0x72   :  { %818 = vmatprep.mubr.f32.mxu1 %v2648_v38 }
  0x74   :  { %664 = vmatpush1.xpose.msra.mxu0 %v2725_v8  ;;  %760 = vmatpush1.xpose.msra.mxu1 %v759_v23 }
  0x75   :  { %766 = vmatprep.subr.mxu1 %v765_v26  ;;  %851 = vmatprep.subr.mxu0 %v2669_v46  ;;  %v2815_v46 = vsub.f32 %v615_v33, %v2798_v35  ;;  %v611_v33 = vld [vmem:[#allocation8 + $0x88] sm:$0xff] }
  0x77   :  { %708 = vmatmul.mubr.f32.vlgmr.msra.gmra.mxu0 %v707_v27  ;;  %v1289_v54 = vand.u32 4294901760, %v2815_v46 }
  0x78   :  { %772 = vmatpush1.xpose.msra.mxu1 %v771_v28  ;;  %854 = vmatpush1.xpose.msra.mxu0 %v2674_v49  ;;  %v2824_v49 = vsub.f32 %v614_v36, %v2807_v41  ;;  %v593_v28 = vld [vmem:[#allocation7 + $0x28] sm:$0xff] }
  0x79   :  { %778 = vmatprep.subr.mxu1 %v777_v30  ;;  %857 = vmatprep.subr.mxu0 %v2684_v55  ;;  %v602_v55 = vld [vmem:[#allocation8 + $0x40] sm:$0xff]  ;;  %v2939_v30 = vand.u32 4294901760, %v593_v28 }
  0x7a   :  { %907 = vmatprep.mubr.f32.mxu0 %v2659_v42  ;;  %v2812_v42 = vand.u32 4294901760, %v609_v37  ;;  %v1295_v62 = vand.u32 4294901760, %v2824_v49 }
  0x7b   :  { %v2952_v36 = vsub.f32 %v593_v28, %v2939_v30 }
  0x7c   :  { %784 = vmatpush1.xpose.msra.mxu1 %v783_v31  ;;  %860 = vmatpush1.xpose.msra.mxu0 %v2697_v59  ;;  %v2835_v56 = vsub.f32 %v609_v37, %v2812_v42  ;;  %v2841_v59 = vand.u32 4294901760, %v590_v51  ;;  %v2948_v31 = vand.u32 4294901760, %v617_v29  ;;  %v2957_v37 = vand.u32 4294901760, %v616_v32 }
  0x7d   :  { %863 = vmatprep.subr.mxu0 %v2711_v3  ;;  %940 = vmatprep.subr.mxu1 %v2654_v39 }
  0x7e   :  { %v1301_v2 = vand.u32 4294901760, %v2835_v56 }
  0x7f   :  { %820 = vmatmul.mubr.f32.vlgmr.msra.gmra.mxu1 %v2691_v58 }
  0x80   :  { %866 = vmatpush1.xpose.msra.mxu0 %v2720_v6  ;;  %942 = vmatpush1.xpose.msra.mxu1 %v2662_v43  ;;  %v1296_v6 = vsub.f32 %v2824_v49, %v1295_v62 }
  0x81   :  { %869 = vmatprep.subr.mxu0 %v2735_v14  ;;  %944 = vmatprep.subr.mxu1 %v2666_v44 }
  0x82   :  { %990 = vmatprep.mubr.f32.mxu1 %v699_v48  ;;  %v1249_v48 = vand.u32 4294901760, %v2802_v40 }
  0x84   :  { %872 = vmatpush1.xpose.msra.mxu0 %v2741_v16  ;;  %946 = vmatpush1.xpose.msra.mxu1 %v2676_v50  ;;  %v1250_v57 = vsub.f32 %v2802_v40, %v1249_v48 }
  0x85   :  { %948 = vmatprep.subr.mxu1 %v2680_v52  ;;  %1026 = vmatprep.subr.mxu0 %v739_v53  ;;  %v2831_v53 = vand.u32 4294901760, %v603_v47 }
  0x86   :  { %v1251_v4 = vand.u32 4294901760, %v1250_v57 }
  0x87   :  { %910 = vmatmul.mubr.f32.vlgmr.msra.gmra.mxu0 %v2715_v5  ;;  %v2861_v3 = vsub.f32 %v603_v47, %v2831_v53  ;;  %v2865_v5 = vsub.f32 %v590_v51, %v2841_v59  ;;  %v605_v47 = vld [vmem:[#allocation8 + $0x58] sm:$0xff]  ;;  %v592_v51 = vld [vmem:[#allocation7 + $0x20] sm:$0xff] }
  0x88   :  { %950 = vmatpush1.xpose.msra.mxu1 %v2699_v60  ;;  %1030 = vmatpush1.xpose.msra.mxu0 %v745_v61  ;;  %v2849_v61 = vand.u32 4294901760, %v602_v55 }
  0x89   :  { %952 = vmatprep.subr.mxu1 %v2707_v63  ;;  %1034 = vmatprep.subr.mxu0 %v751_v1  ;;  %v1313_v11 = vand.u32 4294901760, %v2861_v3  ;;  %v1255_v14 = vand.u32 4294901760, %v2865_v5 }
  0x8a   :  { %1088 = vmatprep.mubr.f32.mxu0 %v2648_v38 }
  0x8b   :  { %v1256_v20 = vsub.f32 %v2865_v5, %v1255_v14 }
  0x8c   :  { %954 = vmatpush1.xpose.msra.mxu1 %v2725_v8  ;;  %1038 = vmatpush1.xpose.msra.mxu0 %v757_v9 }
  0x8d   :  { %1042 = vmatprep.subr.mxu0 %v763_v12  ;;  %1120 = vmatprep.subr.mxu1 %v2654_v39  ;;  %v2826_v39 = vand.u32 4294901760, %v608_v45  ;;  %v1257_v24 = vand.u32 4294901760, %v1256_v20 }
  0x8f   :  { %994 = vmatmul.mubr.f32.vlgmr.msra.gmra.mxu1 %v705_v15 }
  0x90   :  { %1046 = vmatpush1.xpose.msra.mxu0 %v769_v19  ;;  %1122 = vmatpush1.xpose.msra.mxu1 %v2662_v43  ;;  %v597_v43 = vld [vmem:[#allocation8 + $0x18] sm:$0xff] }
  0x91   :  { %1050 = vmatprep.subr.mxu0 %v775_v21  ;;  %1124 = vmatprep.subr.mxu1 %v2666_v44  ;;  %v2847_v44 = vsub.f32 %v608_v45, %v2826_v39  ;;  %v2857_v1 = vand.u32 4294901760, %v597_v43  ;;  %v610_v45 = vld [vmem:[#allocation8 + $0x80] sm:$0xff] }
  0x92   :  { %1168 = vmatprep.mubr.f32.mxu1 %v2648_v38  ;;  %v1290_v38 = vsub.f32 %v2815_v46, %v1289_v54 }
  0x93   :  { %v1307_v9 = vand.u32 4294901760, %v2847_v44  ;;  %v2885_v12 = vsub.f32 %v597_v43, %v2857_v1 }
  0x94   :  { %1054 = vmatpush1.xpose.msra.mxu0 %v781_v25  ;;  %1126 = vmatpush1.xpose.msra.mxu1 %v2676_v50  ;;  %v596_v50 = vld [vmem:[#allocation8 + $0x10] sm:$0xff]  ;;  %v1291_v10 = vand.u32 4294901760, %v1290_v38 }
  0x95   :  { %1128 = vmatprep.subr.mxu1 %v2680_v52  ;;  %1200 = vmatprep.subr.mxu0 %v2798_v35  ;;  %v2870_v52 = vsub.f32 %v602_v55, %v2849_v61  ;;  %v2875_v7 = vand.u32 4294901760, %v596_v50  ;;  %v1308_v0 = vsub.f32 %v2847_v44, %v1307_v9  ;;  %v1325_v19 = vand.u32 4294901760, %v2885_v12 }
  0x97   :  { %1090 = vmatmul.mubr.f32.vlgmr.msra.gmra.mxu0 %v2691_v58  ;;  %v2891_v15 = vsub.f32 %v596_v50, %v2875_v7  ;;  %v1319_v16 = vand.u32 4294901760, %v2870_v52  ;;  %v1309_v13 = vand.u32 4294901760, %v1308_v0 }
  0x98   :  { %1130 = vmatpush1.xpose.msra.mxu1 %v2699_v60  ;;  %1202 = vmatpush1.xpose.msra.mxu0 %v2807_v41  ;;  %v1302_v60 = vsub.f32 %v2835_v56, %v1301_v2 }
  0x99   :  { %1132 = vmatprep.subr.mxu1 %v2707_v63  ;;  %1204 = vmatprep.subr.mxu0 %v2812_v42  ;;  %v1297_v63 = vand.u32 4294901760, %v1296_v6  ;;  %v1320_v21 = vsub.f32 %v2870_v52, %v1319_v16  ;;  %v1331_v22 = vand.u32 4294901760, %v2891_v15 }
  0x9a   :  { %1252 = vmatprep.mubr.f32.mxu0 %v1251_v4  ;;  %v1303_v18 = vand.u32 4294901760, %v1302_v60 }
  0x9b   :  { %v1321_v25 = vand.u32 4294901760, %v1320_v21  ;;  %v1332_v26 = vsub.f32 %v2891_v15, %v1331_v22 }
  0x9c   :  { %1134 = vmatpush1.xpose.msra.mxu1 %v2725_v8  ;;  %1206 = vmatpush1.xpose.msra.mxu0 %v2826_v39  ;;  %v1314_v8 = vsub.f32 %v2861_v3, %v1313_v11 }
  0x9d   :  { %1208 = vmatprep.subr.mxu0 %v2831_v53  ;;  %1292 = vmatprep.subr.mxu1 %v1291_v10  ;;  %v1333_v27 = vand.u32 4294901760, %v1332_v26 }
  0x9e   :  { %v1315_v23 = vand.u32 4294901760, %v1314_v8 }
  0x9f   :  { %1170 = vmatmul.mubr.f32.vlgmr.msra.gmra.mxu1 %v2691_v58  ;;  %v1326_v58 = vsub.f32 %v2885_v12, %v1325_v19 }
  0xa0   :  { %1210 = vmatpush1.xpose.msra.mxu0 %v2849_v61  ;;  %1298 = vmatpush1.xpose.msra.mxu1 %v1297_v63 }
  0xa1   :  { %1212 = vmatprep.subr.mxu0 %v2857_v1  ;;  %1304 = vmatprep.subr.mxu1 %v1303_v18  ;;  %v1327_v17 = vand.u32 4294901760, %v1326_v58 }
  0xa2   :  { %1368 = vmatprep.mubr.f32.mxu1 %v2789_v34 }
  0xa4   :  { %1214 = vmatpush1.xpose.msra.mxu0 %v2875_v7  ;;  %1310 = vmatpush1.xpose.msra.mxu1 %v1309_v13 }
  0xa5   :  { %1316 = vmatprep.subr.mxu1 %v1315_v23  ;;  %1401 = vmatprep.subr.mxu0 %v2815_v46  ;;  %v2965_v46 = vsub.f32 %v617_v29, %v2948_v31 }
  0xa7   :  { %1258 = vmatmul.mubr.f32.vlgmr.msra.gmra.mxu0 %v1257_v24  ;;  %v1839_v55 = vand.u32 4294901760, %v2965_v46 }
  0xa8   :  { %1322 = vmatpush1.xpose.msra.mxu1 %v1321_v25  ;;  %1404 = vmatpush1.xpose.msra.mxu0 %v2824_v49  ;;  %v2974_v49 = vsub.f32 %v616_v32, %v2957_v37 }
  0xa9   :  { %1328 = vmatprep.subr.mxu1 %v1327_v17  ;;  %1407 = vmatprep.subr.mxu0 %v2835_v56  ;;  %v604_v56 = vld [vmem:[#allocation8 + $0x50] sm:$0xff] }
  0xaa   :  { %1457 = vmatprep.mubr.f32.mxu0 %v2802_v40  ;;  %v2962_v40 = vand.u32 4294901760, %v611_v33  ;;  %v1845_v38 = vand.u32 4294901760, %v2974_v49 }
  0xac   :  { %1334 = vmatpush1.xpose.msra.mxu1 %v1333_v27  ;;  %1410 = vmatpush1.xpose.msra.mxu0 %v2847_v44  ;;  %v2985_v43 = vsub.f32 %v611_v33, %v2962_v40  ;;  %v2991_v44 = vand.u32 4294901760, %v592_v51 }
  0xad   :  { %1413 = vmatprep.subr.mxu0 %v2861_v3  ;;  %1490 = vmatprep.subr.mxu1 %v2798_v35 }
  0xae   :  { %v1851_v50 = vand.u32 4294901760, %v2985_v43 }
  0xaf   :  { %1370 = vmatmul.mubr.f32.vlgmr.msra.gmra.mxu1 %v2841_v59 }
  0xb0   :  { %1416 = vmatpush1.xpose.msra.mxu0 %v2870_v52  ;;  %1492 = vmatpush1.xpose.msra.mxu1 %v2807_v41  ;;  %v1846_v52 = vsub.f32 %v2974_v49, %v1845_v38 }
  0xb1   :  { %1419 = vmatprep.subr.mxu0 %v2885_v12  ;;  %1494 = vmatprep.subr.mxu1 %v2812_v42 }
  0xb2   :  { %1540 = vmatprep.mubr.f32.mxu1 %v1249_v48  ;;  %v1799_v48 = vand.u32 4294901760, %v2952_v36 }
  0xb4   :  { %1422 = vmatpush1.xpose.msra.mxu0 %v2891_v15  ;;  %1496 = vmatpush1.xpose.msra.mxu1 %v2826_v39  ;;  %v1800_v57 = vsub.f32 %v2952_v36, %v1799_v48 }
  0xb5   :  { %1498 = vmatprep.subr.mxu1 %v2831_v53  ;;  %1576 = vmatprep.subr.mxu0 %v1289_v54  ;;  %v2981_v54 = vand.u32 4294901760, %v605_v47 }
  0xb6   :  { %v1801_v4 = vand.u32 4294901760, %v1800_v57 }
  0xb7   :  { %1460 = vmatmul.mubr.f32.vlgmr.msra.gmra.mxu0 %v2865_v5  ;;  %v3011_v3 = vsub.f32 %v605_v47, %v2981_v54  ;;  %v3015_v5 = vsub.f32 %v592_v51, %v2991_v44 }
  0xb8   :  { %1500 = vmatpush1.xpose.msra.mxu1 %v2849_v61  ;;  %1580 = vmatpush1.xpose.msra.mxu0 %v1295_v62  ;;  %v2999_v62 = vand.u32 4294901760, %v604_v56 }
  0xb9   :  { %1502 = vmatprep.subr.mxu1 %v2857_v1  ;;  %1584 = vmatprep.subr.mxu0 %v1301_v2  ;;  %v1863_v60 = vand.u32 4294901760, %v3011_v3  ;;  %v1805_v12 = vand.u32 4294901760, %v3015_v5 }
  0xba   :  { %1638 = vmatprep.mubr.f32.mxu0 %v2789_v34 }
  0xbb   :  { %v1806_v18 = vsub.f32 %v3015_v5, %v1805_v12 }
  0xbc   :  { %1504 = vmatpush1.xpose.msra.mxu1 %v2875_v7  ;;  %1588 = vmatpush1.xpose.msra.mxu0 %v1307_v9 }
  0xbd   :  { %1592 = vmatprep.subr.mxu0 %v1313_v11  ;;  %1670 = vmatprep.subr.mxu1 %v2798_v35  ;;  %v2976_v35 = vand.u32 4294901760, %v610_v45 }
  0xbf   :  { %1544 = vmatmul.mubr.f32.vlgmr.msra.gmra.mxu1 %v1255_v14 }
  0xc0   :  { %1596 = vmatpush1.xpose.msra.mxu0 %v1319_v16  ;;  %1672 = vmatpush1.xpose.msra.mxu1 %v2807_v41  ;;  %v599_v41 = vld [vmem:[#allocation8 + $0x28] sm:$0xff] }
  0xc1   :  { %1600 = vmatprep.subr.mxu0 %v1325_v19  ;;  %1674 = vmatprep.subr.mxu1 %v2812_v42  ;;  %v2997_v42 = vsub.f32 %v610_v45, %v2976_v35  ;;  %v3007_v2 = vand.u32 4294901760, %v599_v41 }
  0xc2   :  { %1718 = vmatprep.mubr.f32.mxu1 %v2789_v34  ;;  %v1840_v34 = vsub.f32 %v2965_v46, %v1839_v55 }
  0xc3   :  { %v1857_v9 = vand.u32 4294901760, %v2997_v42  ;;  %v3035_v11 = vsub.f32 %v599_v41, %v3007_v2 }
  0xc4   :  { %1604 = vmatpush1.xpose.msra.mxu0 %v1331_v22  ;;  %1676 = vmatpush1.xpose.msra.mxu1 %v2826_v39  ;;  %v598_v39 = vld [vmem:[#allocation8 + $0x20] sm:$0xff]  ;;  %v1841_v10 = vand.u32 4294901760, %v1840_v34  ;;  %v1807_v22 = vand.u32 4294901760, %v1806_v18 }
  0xc5   :  { %1678 = vmatprep.subr.mxu1 %v2831_v53  ;;  %1750 = vmatprep.subr.mxu0 %v2948_v31  ;;  %v3020_v53 = vsub.f32 %v604_v56, %v2999_v62  ;;  %v3025_v6 = vand.u32 4294901760, %v598_v39  ;;  %v1858_v63 = vsub.f32 %v2997_v42, %v1857_v9  ;;  %v1875_v16 = vand.u32 4294901760, %v3035_v11 }
  0xc7   :  { %1640 = vmatmul.mubr.f32.vlgmr.msra.gmra.mxu0 %v2841_v59  ;;  %v3041_v14 = vsub.f32 %v598_v39, %v3025_v6  ;;  %v1869_v15 = vand.u32 4294901760, %v3020_v53  ;;  %v1859_v8 = vand.u32 4294901760, %v1858_v63  ;;  %v1876_v21 = vsub.f32 %v3035_v11, %v1875_v16 }
  0xc8   :  { %1680 = vmatpush1.xpose.msra.mxu1 %v2849_v61  ;;  %1752 = vmatpush1.xpose.msra.mxu0 %v2957_v37  ;;  %v1852_v61 = vsub.f32 %v2985_v43, %v1851_v50 }
  0xc9   :  { %1682 = vmatprep.subr.mxu1 %v2857_v1  ;;  %1754 = vmatprep.subr.mxu0 %v2962_v40  ;;  %v1847_v1 = vand.u32 4294901760, %v1846_v52  ;;  %v1870_v19 = vsub.f32 %v3020_v53, %v1869_v15  ;;  %v1881_v20 = vand.u32 4294901760, %v3041_v14  ;;  %v1877_v58 = vand.u32 4294901760, %v1876_v21 }
  0xca   :  { %1802 = vmatprep.mubr.f32.mxu0 %v1801_v4  ;;  %v1853_v0 = vand.u32 4294901760, %v1852_v61 }
  0xcb   :  { %v1882_v23 = vsub.f32 %v3041_v14, %v1881_v20 }
  0xcc   :  { %1684 = vmatpush1.xpose.msra.mxu1 %v2875_v7  ;;  %1756 = vmatpush1.xpose.msra.mxu0 %v2976_v35  ;;  %v1864_v7 = vsub.f32 %v3011_v3, %v1863_v60 }
  0xcd   :  { %1758 = vmatprep.subr.mxu0 %v2981_v54  ;;  %1842 = vmatprep.subr.mxu1 %v1841_v10  ;;  %v1883_v24 = vand.u32 4294901760, %v1882_v23 }
  0xce   :  { %v1865_v13 = vand.u32 4294901760, %v1864_v7 }
  0xcf   :  { %1720 = vmatmul.mubr.f32.vlgmr.msra.gmra.mxu1 %v2841_v59  ;;  %v1871_v59 = vand.u32 4294901760, %v1870_v19 }
  0xd0   :  { %1760 = vmatpush1.xpose.msra.mxu0 %v2999_v62  ;;  %1848 = vmatpush1.xpose.msra.mxu1 %v1847_v1 }
  0xd1   :  { %1762 = vmatprep.subr.mxu0 %v3007_v2  ;;  %1854 = vmatprep.subr.mxu1 %v1853_v0 }
  0xd2   :  { %1918 = vmatprep.mubr.f32.mxu1 %v2939_v30 }
  0xd4   :  { %1764 = vmatpush1.xpose.msra.mxu0 %v3025_v6  ;;  %1860 = vmatpush1.xpose.msra.mxu1 %v1859_v8 }
  0xd5   :  { %1866 = vmatprep.subr.mxu1 %v1865_v13  ;;  %1951 = vmatprep.subr.mxu0 %v2965_v46 }
  0xd7   :  { %1808 = vmatmul.mubr.f32.vlgmr.msra.gmra.mxu0 %v1807_v22 }
  0xd8   :  { %1872 = vmatpush1.xpose.msra.mxu1 %v1871_v59  ;;  %1954 = vmatpush1.xpose.msra.mxu0 %v2974_v49 }
  0xd9   :  { %1878 = vmatprep.subr.mxu1 %v1877_v58  ;;  %1957 = vmatprep.subr.mxu0 %v2985_v43 }
  0xda   :  { %2007 = vmatprep.mubr.f32.mxu0 %v2952_v36 }
  0xdc   :  { %1884 = vmatpush1.xpose.msra.mxu1 %v1883_v24  ;;  %1960 = vmatpush1.xpose.msra.mxu0 %v2997_v42 }
  0xdd   :  { %1963 = vmatprep.subr.mxu0 %v3011_v3  ;;  %2040 = vmatprep.subr.mxu1 %v2948_v31 }
  0xdf   :  { %1920 = vmatmul.mubr.f32.vlgmr.msra.gmra.mxu1 %v2991_v44 }
  0xe0   :  { %1966 = vmatpush1.xpose.msra.mxu0 %v3020_v53  ;;  %2042 = vmatpush1.xpose.msra.mxu1 %v2957_v37 }
  0xe1   :  { %1969 = vmatprep.subr.mxu0 %v3035_v11  ;;  %2044 = vmatprep.subr.mxu1 %v2962_v40 }
  0xe2   :  { %2090 = vmatprep.mubr.f32.mxu1 %v1799_v48 }
  0xe4   :  { %1972 = vmatpush1.xpose.msra.mxu0 %v3041_v14  ;;  %2046 = vmatpush1.xpose.msra.mxu1 %v2976_v35 }
  0xe5   :  { %2048 = vmatprep.subr.mxu1 %v2981_v54  ;;  %2126 = vmatprep.subr.mxu0 %v1839_v55 }
  0xe7   :  { %2010 = vmatmul.mubr.f32.vlgmr.msra.gmra.mxu0 %v3015_v5 }
  0xe8   :  { %2050 = vmatpush1.xpose.msra.mxu1 %v2999_v62  ;;  %2130 = vmatpush1.xpose.msra.mxu0 %v1845_v38 }
  0xe9   :  { %2052 = vmatprep.subr.mxu1 %v3007_v2  ;;  %2134 = vmatprep.subr.mxu0 %v1851_v50 }
  0xea   :  { %2188 = vmatprep.mubr.f32.mxu0 %v2939_v30 }
  0xec   :  { %2054 = vmatpush1.xpose.msra.mxu1 %v3025_v6  ;;  %2138 = vmatpush1.xpose.msra.mxu0 %v1857_v9 }
  0xed   :  { %2142 = vmatprep.subr.mxu0 %v1863_v60  ;;  %2220 = vmatprep.subr.mxu1 %v2948_v31  ;;  %v2299_v31 = vld [vmem:[%s3117_s2] ss:$0 sm:$0xff]  ;;  %s2527_s2 = smov 32  }
  0xef   :  { %2094 = vmatmul.mubr.f32.vlgmr.msra.gmra.mxu1 %v1805_v12 }
  0xf0   :  { %2146 = vmatpush1.xpose.msra.mxu0 %v1869_v15  ;;  %2222 = vmatpush1.xpose.msra.mxu1 %v2957_v37 }
  0xf1   :  { %2150 = vmatprep.subr.mxu0 %v1875_v16  ;;  %2224 = vmatprep.subr.mxu1 %v2962_v40 }
  0xf2   :  { %2268 = vmatprep.mubr.f32.mxu1 %v2939_v30 }
  0xf4   :  { %2154 = vmatpush1.xpose.msra.mxu0 %v1881_v20  ;;  %2226 = vmatpush1.xpose.msra.mxu1 %v2976_v35 }
  0xf5   :  { %2228 = vmatprep.subr.mxu1 %v2981_v54  ;;  %v2300_v54 = vld [vmem:[%s3120_s5] ss:$0 sm:$0xff]  ;;  %s2528_s5 = smov [#allocation10]  }
  0xf6   :  { %s2288_s21 = sshll.u32 %s2528_s5, 4  ;;  %s2289_s21 = int_to_ptr.vmem [resolvable:$true] %s2288_s21 }
  0xf7   :  { %2190 = vmatmul.mubr.f32.vlgmr.msra.gmra.mxu0 %v2991_v44  ;;  %s2489_s22 = scalar_lea.vmem %s2289_s21, 128  ;;  %p2494_p7 = scmp.lt.s32.totalorder %s2289_s21, %s2289_s21 }
  0xf8   :  { %2230 = vmatpush1.xpose.msra.mxu1 %v2999_v62  ;;  %p2490_p6 = scmp.ne.s32.totalorder %s2289_s21, %s2489_s22  ;;  %p2495_p8 = scmp.lt.s32.totalorder %s2489_s22, %s2489_s22 }
  0xf9   :  { %2232 = vmatprep.subr.mxu1 %v3007_v2 }
  0xfa   :  { %p2496_p9 = por %p2495_p8, %p2494_p7 }
  0xfc   :  { %2234 = vmatpush1.xpose.msra.mxu1 %v3025_v6  ;;  %p2497_p10 = pnand %p2496_p9, %p2490_p6 }
  0xff   :  { %2270 = vmatmul.mubr.f32.vlgmr.msra.gmra.mxu1 %v2991_v44 }
 0x107   :  { %v178_v25 = vpop.f32.mrf.mxu0 }
 0x108   :  { %v179_v33 = vadd.f32 %v2299_v31, %v178_v25 }
 0x109   :  { %v2341_v26 = vpop.f32.mrf.mxu0 }
 0x10f   :  { %v269_v17 = vpop.f32.mrf.mxu1 }
 0x110   :  { %v270_v37 = vadd.f32 %v269_v17, %v179_v33 }
 0x111   :  { %v2352_v27 = vpop.f32.mrf.mxu1 }
 0x117   :  { %v349_v28 = vpop.f32.mrf.mxu0 }
 0x118   :  { %v350_v45 = vadd.f32 %v349_v28, %v270_v37 }
 0x119   :  { %v2363_v29 = vpop.f32.mrf.mxu0 }
 0x11f   :  { %v426_v30 = vpop.f32.mrf.mxu1 }
 0x120   :  { %v427_v46 = vadd.f32 %v426_v30, %v350_v45 }
 0x121   :  { %v2374_v32 = vpop.f32.mrf.mxu1 }
 0x127   :  { %v509_v36 = vpop.f32.mrf.mxu0 }
 0x128   :  { %v510_v47 = vadd.f32 %v509_v36, %v427_v46 }
 0x129   :  { %v2385_v40 = vpop.f32.mrf.mxu0 }
 0x12f   :  { %v584_v48 = vpop.f32.mrf.mxu1 }
 0x130   :  { %v585_v49 = vadd.f32 %v584_v48, %v510_v47 }
 0x131   :  { %v2396_v35 = vpop.f32.mrf.mxu1 }
 0x132   :  { %2275 = vst.msk [vmem:[#allocation10] sm:$0xff] %vm87_vm1, %v585_v49 }
 0x137   :  { %v709_v51 = vpop.f32.mrf.mxu0 }
 0x138   :  { %v710_v56 = vadd.f32 %v2300_v54, %v709_v51 }
 0x139   :  { %v711_v55 = vpop.f32.mrf.mxu0 }
 0x13f   :  { %v821_v43 = vpop.f32.mrf.mxu1 }
 0x140   :  { %v822_v41 = vadd.f32 %v821_v43, %v710_v56 }
 0x141   :  { %v823_v57 = vpop.f32.mrf.mxu1 }
 0x147   :  { %v911_v44 = vpop.f32.mrf.mxu0 }
 0x148   :  { %v912_v42 = vadd.f32 %v911_v44, %v822_v41 }
 0x149   :  { %v913_v62 = vpop.f32.mrf.mxu0 }
 0x14f   :  { %v995_v38 = vpop.f32.mrf.mxu1 }
 0x150   :  { %v996_v34 = vadd.f32 %v995_v38, %v912_v42 }
 0x151   :  { %v997_v2 = vpop.f32.mrf.mxu1 }
 0x157   :  { %v1091_v50 = vpop.f32.mrf.mxu0 }
 0x158   :  { %v1092_v39 = vadd.f32 %v1091_v50, %v996_v34 }
 0x159   :  { %v1093_v3 = vpop.f32.mrf.mxu0 }
 0x15f   :  { %v1171_v4 = vpop.f32.mrf.mxu1 }
 0x160   :  { %v1172_v5 = vadd.f32 %v1171_v4, %v1092_v39 }
 0x161   :  { %v1173_v53 = vpop.f32.mrf.mxu1 }
 0x167   :  { %v1259_v52 = vpop.f32.mrf.mxu0 }
 0x168   :  { %v1260_v6 = vadd.f32 %v1259_v52, %v1172_v5 }
 0x169   :  { %v1261_v9 = vpop.f32.mrf.mxu0 }
 0x16f   :  { %v1371_v10 = vpop.f32.mrf.mxu1 }
 0x170   :  { %v1372_v13 = vadd.f32 %v1371_v10, %v1260_v6 }
 0x171   :  { %v1373_v61 = vpop.f32.mrf.mxu1 }
 0x177   :  { %v1461_v60 = vpop.f32.mrf.mxu0 }
 0x178   :  { %v1462_v21 = vadd.f32 %v1461_v60, %v1372_v13 }
 0x179   :  { %v1463_v11 = vpop.f32.mrf.mxu0 }
 0x17f   :  { %v1545_v12 = vpop.f32.mrf.mxu1 }
 0x180   :  { %v1546_v59 = vadd.f32 %v1545_v12, %v1462_v21 }
 0x181   :  { %v1547_v1 = vpop.f32.mrf.mxu1 }
 0x187   :  { %v1641_v14 = vpop.f32.mrf.mxu0 }
 0x188   :  { %v1642_v58 = vadd.f32 %v1641_v14, %v1546_v59 }
 0x189   :  { %v1643_v63 = vpop.f32.mrf.mxu0 }
 0x18f   :  { %v1721_v15 = vpop.f32.mrf.mxu1 }
 0x190   :  { %v1722_v24 = vadd.f32 %v1721_v15, %v1642_v58 }
 0x191   :  { %v1723_v0 = vpop.f32.mrf.mxu1 }
 0x197   :  { %v1809_v7 = vpop.f32.mrf.mxu0 }
 0x198   :  { %v1810_v25 = vadd.f32 %v1809_v7, %v1722_v24 }
 0x199   :  { %v1811_v16 = vpop.f32.mrf.mxu0 }
 0x19f   :  { %v1921_v18 = vpop.f32.mrf.mxu1 }
 0x1a0   :  { %v1922_v17 = vadd.f32 %v1921_v18, %v1810_v25 }
 0x1a1   :  { %v1923_v8 = vpop.f32.mrf.mxu1 }
 0x1a7   :  { %v2011_v19 = vpop.f32.mrf.mxu0 }
 0x1a8   :  { %v2012_v28 = vadd.f32 %v2011_v19, %v1922_v17 }
 0x1a9   :  { %v2013_v20 = vpop.f32.mrf.mxu0 }
 0x1af   :  { %v2095_v22 = vpop.f32.mrf.mxu1 }
 0x1b0   :  { %v2096_v29 = vadd.f32 %v2095_v22, %v2012_v28 }
 0x1b1   :  { %v2097_v23 = vpop.f32.mrf.mxu1 }
 0x1b7   :  { %v2191_v26 = vpop.f32.mrf.mxu0 }
 0x1b8   :  { %v2192_v30 = vadd.f32 %v2191_v26, %v2096_v29 }
 0x1b9   :  { %v2193_v27 = vpop.f32.mrf.mxu0 }
 0x1bf   :  { %v2271_v31 = vpop.f32.mrf.mxu1 }
 0x1c0   :  { %v2272_v32 = vadd.f32 %v2271_v31, %v2192_v30 }
 0x1c1   :  { %v2273_v33 = vpop.f32.mrf.mxu1 }
 0x1c2   :  { %2277 = vrot.lane.b32.xlu0 %v2272_v32, %s2527_s2 }
 0x234   :  { %v2278_v36 = vpop.permute.xlu0 %2277 }
 0x235   :  { %2281 = vst.msk [vmem:[#allocation10] sm:$0xff] %vm2280_vm2, %v2278_v36 }
 0x236   :  { %2500 = shalt.err (!%p2497_p10)
}
 0x237   :  { %2291 = dma.vmem_to_hbm [thread:$0]  %s2289_s21, 128, %s3121_s6, [#allocation4]  }
 0x238   :  { %2515 = dma.done.wait [#allocation4], 128  }
 0x239   :  { %2516 = vsyncadd [#allocation4], 4294967168 }
 0x23a   :  { %2295 = vsyncpa [#allocation3], 1 }
 0x23b   :  { %2296 = vsyncpa [#allocation6], 1 }
 0x23c   :  { %2297 = vsyncpa [#allocation9], 1 }
 0x23d   :  { %2298 = vsyncpa [#allocation4], 1 }

</bundles_post_ra>
